<compile_context>
chip_gen: v6e
topology: v6e:2x2x1
jax: 0.10.0
libtpu: 0.0.40
codegen_flags: <defaults>
</compile_context>

<pallas_src>
import functools

import jax
import jax.numpy as jnp
from jax import lax
from jax.experimental import pallas as pl
from jax.experimental.pallas import tpu as pltpu

_LANES = 128
_SUBLANES = 8


def _cdiv(a, b):
    return -(-a // b)


def _round_up(a, m):
    return _cdiv(a, m) * m


def _dice_partial_kernel(logits_ref, targets_ref, inter_ref, union_ref, *,
                         hw, tile_rows, has_pad):
    """Per-tile channel softmax + per-lane partial dice sums.

    logits_ref / targets_ref : (1, C, T, 128) VMEM tiles (input dtype)
    inter_ref / union_ref    : (1, 1, C, 128) f32 accumulators, resident
                               across the spatial grid axis (s).
    """
    s = pl.program_id(2)

    @pl.when(s == 0)
    def _init():
        inter_ref[...] = jnp.zeros_like(inter_ref)
        union_ref[...] = jnp.zeros_like(union_ref)

    logits = logits_ref[...].astype(jnp.float32)     # (1, C, T, 128)
    targets = targets_ref[...].astype(jnp.float32)   # (1, C, T, 128)

    # Numerically stable softmax over channels (axis=1).  The channel axis is
    # an outer axis over dense (T, 128) slabs, so max/sub/sum are pure VPU
    # elementwise ops across C slabs; exp + reciprocal go to the EUP slot.
    m = jnp.max(logits, axis=1, keepdims=True)       # (1, 1, T, 128)
    e = jnp.exp(logits - m)
    denom = jnp.sum(e, axis=1, keepdims=True)
    probs = e * pl.reciprocal(denom)                 # exact reciprocal (EUP)

    def _accumulate(pr):
        # Reduce only the row (sublane) axis per tile; keep lanes dense so the
        # accumulator store is vreg-aligned and unmasked.
        inter = jnp.sum(pr * targets, axis=2)                    # (1, C, 128)
        union = jnp.sum(pr, axis=2) + jnp.sum(targets, axis=2)   # (1, C, 128)
        inter_ref[...] += inter.reshape(inter_ref.shape)
        union_ref[...] += union.reshape(union_ref.shape)

    if has_pad:
        # Only the tile(s) overlapping the padded tail pay for masking;
        # interior tiles take the cheap path at runtime via pl.when.
        p = pl.program_id(1)
        n_s = pl.num_programs(2)
        tile_elems = tile_rows * _LANES
        tile_start = (p * n_s + s) * tile_elems

        @pl.when(tile_start + tile_elems <= hw)
        def _interior():
            _accumulate(probs)

        @pl.when(tile_start + tile_elems > hw)
        def _tail():
            # Padded logits are exact zeros (softmax -> 1/C, never NaN) but
            # must not contribute to sum(probs).  Padded targets are already
            # zero, so only probs needs the select (keep a select, not a
            # multiply, per the correctness note on undefined/NaN data).
            row = lax.broadcasted_iota(jnp.int32, (1, 1, tile_rows, _LANES), 2)
            lane = lax.broadcasted_iota(jnp.int32, (1, 1, tile_rows, _LANES), 3)
            flat = tile_start + row * _LANES + lane
            _accumulate(jnp.where(flat < hw, probs, 0.0))
    else:
        _accumulate(probs)


def _vmem_limit_bytes():
    """Scoped-VMEM limit per generation: ~75% of per-TC physical VMEM, capped
    at 64 MiB (v5e/v6e have 128 MiB physical, v7x only 64 MiB)."""
    try:
        cap = pltpu.get_tpu_info().vmem_capacity_bytes
    except Exception:
        cap = 64 * 1024 * 1024
    return min((cap * 3) // 4, 64 * 1024 * 1024)


def _choose_tiling(n_rows, c, in_bytes, p_split, vmem_limit):
    """Rows-per-tile (multiple of 8) and spatial steps per parallel split.

    Footprint model per grid step: 2 pipeline buffers for each input tile in
    its own dtype plus ~5 live f32 temporaries of tile size in the body
    (logits/targets casts, e, probs, product), plus slack for accumulators
    and Mosaic-internal scratch.
    """
    budget = max(vmem_limit - 8 * 1024 * 1024, 4 * 1024 * 1024)
    bytes_per_row = c * _LANES * (2 * in_bytes + 5 * 4)
    max_rows = max(_SUBLANES,
                   (budget // bytes_per_row) // _SUBLANES * _SUBLANES)
    chunk = _cdiv(n_rows, p_split)
    n_steps = _cdiv(chunk, max_rows)
    tile_rows = _round_up(_cdiv(chunk, n_steps), _SUBLANES)
    return tile_rows, n_steps


def dice_loss(logits, targets, smooth=1.0):
    assert logits.ndim == 4, f"logits must be 4D, got {logits.shape}"
    assert targets.ndim == 4, f"targets must be 4D (one-hot), got {targets.shape}"
    assert logits.shape == targets.shape, (
        f"Shape mismatch: logits {logits.shape}, targets {targets.shape}")
    N, C, H, W = logits.shape
    HW = H * W

    # Keep the HBM dtype (bf16 stays bf16); the f32 cast is per-tile in VMEM.
    lf = logits.reshape(N, C, HW)
    tf = targets.reshape(N, C, HW)

    n_rows = _cdiv(HW, _LANES)
    # Split the spatial reduction into two parallel chunks so both v7x
    # TensorCores stay busy even when N == 1 (near-neutral on 1-TC chips).
    p_split = 2 if n_rows >= 2 else 1

    in_bytes = jnp.dtype(lf.dtype).itemsize + jnp.dtype(tf.dtype).itemsize
    vmem_limit = _vmem_limit_bytes()
    tile_rows, n_steps = _choose_tiling(n_rows, C, in_bytes, p_split, vmem_limit)

    rows_pad = p_split * n_steps * tile_rows
    hw_pad = rows_pad * _LANES
    # TODO(synk): for very small HW, pack several batch images per block to
    # amortize the ~0.35us/grid-step overhead instead of padding each image.
    if hw_pad != HW:
        lf = jnp.pad(lf, ((0, 0), (0, 0), (0, hw_pad - HW)))
        tf = jnp.pad(tf, ((0, 0), (0, 0), (0, hw_pad - HW)))
    # Spatial axis fills both sublane and lane dims -> dense (8,128) vregs.
    lf = lf.reshape(N, C, rows_pad, _LANES)
    tf = tf.reshape(N, C, rows_pad, _LANES)

    kernel = functools.partial(_dice_partial_kernel, hw=HW,
                               tile_rows=tile_rows, has_pad=(hw_pad != HW))

    def in_map(n, p, s):
        return (n, 0, p * n_steps + s, 0)

    def out_map(n, p, s):
        return (n, p, 0, 0)

    inter, union = pl.pallas_call(
        kernel,
        out_shape=(
            jax.ShapeDtypeStruct((N, p_split, C, _LANES), jnp.float32),
            jax.ShapeDtypeStruct((N, p_split, C, _LANES), jnp.float32),
        ),
        grid=(N, p_split, n_steps),
        in_specs=[
            pl.BlockSpec((1, C, tile_rows, _LANES), in_map),
            pl.BlockSpec((1, C, tile_rows, _LANES), in_map),
        ],
        out_specs=(
            pl.BlockSpec((1, 1, C, _LANES), out_map),
            pl.BlockSpec((1, 1, C, _LANES), out_map),
        ),
        compiler_params=pltpu.CompilerParams(
            dimension_semantics=("parallel", "parallel", "arbitrary"),
            vmem_limit_bytes=vmem_limit,
        ),
    )(lf, tf)

    # Tiny O(N*C*128) finalization in plain XLA.
    inter = jnp.sum(inter, axis=(1, 3))   # (N, C)
    union = jnp.sum(union, axis=(1, 3))   # (N, C)
    dice = (2.0 * inter + smooth) / (union + smooth)
    return 1.0 - jnp.mean(dice)


def _dice_loss_ref(logits, targets, smooth=1.0):
    probs = jax.nn.softmax(logits.astype(jnp.float32), axis=1)
    targets = targets.astype(jnp.float32)
    intersection = jnp.sum(probs * targets, axis=(2, 3))
    union = jnp.sum(probs + targets, axis=(2, 3))
    dice = (2.0 * intersection + smooth) / (union + smooth)
    return 1.0 - jnp.mean(dice)


if __name__ == "__main__":
    key = jax.random.PRNGKey(0)
    k_logits, k_labels = jax.random.split(key)

    N, C, H, W = 2, 4, 16, 16
    logits = jax.random.normal(k_logits, (N, C, H, W), dtype=jnp.float32)
    # one-hot targets along the channel dim (NCHW), as the module expects
    labels = jax.random.randint(k_labels, (N, H, W), 0, C)
    targets = jax.nn.one_hot(labels, C, axis=1, dtype=jnp.float32)  # (N,C,H,W)

    loss = dice_loss(logits, targets, smooth=1.0)
    jax.block_until_ready(loss)

    ref = _dice_loss_ref(logits, targets, smooth=1.0)
    assert jnp.allclose(loss, ref, atol=1e-5, rtol=1e-5), (loss, ref)

    print("KERNEL_OK")
</pallas_src>

<mosaic_0001>
module attributes {stable_mosaic.version = 11 : i64} {
  func.func @_dice_partial_kernel(%arg0: i32, %arg1: i32, %arg2: i32, %arg3: memref<1x4x8x128xf32, #tpu.memory_space<vmem>>, %arg4: memref<1x4x8x128xf32, #tpu.memory_space<vmem>>, %arg5: memref<1x1x4x128xf32, #tpu.memory_space<vmem>>, %arg6: memref<1x1x4x128xf32, #tpu.memory_space<vmem>>) attributes {dimension_semantics = [#tpu.dimension_semantics<parallel>, #tpu.dimension_semantics<parallel>, #tpu.dimension_semantics<arbitrary>], iteration_bounds = array<i64: 2, 2, 1>, scalar_prefetch = 0 : i64, scratch_operands = 0 : i64, tpu.core_type = #tpu.core_type<tc>, window_params = [{transform_indices = @transform_0, window_bounds = array<i64: 1, 4, 8, 128>}, {transform_indices = @transform_1, window_bounds = array<i64: 1, 4, 8, 128>}, {transform_indices = @transform_2, window_bounds = array<i64: 1, 1, 4, 128>}, {transform_indices = @transform_3, window_bounds = array<i64: 1, 1, 4, 128>}]} {
    %c0_i32 = arith.constant 0 : i32
    %0 = arith.cmpi eq, %arg2, %c0_i32 : i32
    %1 = arith.extui %0 : i1 to i32
    %c0_i32_0 = arith.constant 0 : i32
    %2 = arith.cmpi ne, %1, %c0_i32_0 : i32
    scf.if %2 {
      %cst_14 = arith.constant 0.000000e+00 : f32
      %26 = vector.broadcast %cst_14 : f32 to vector<1x1x4x128xf32>
      %c0_15 = arith.constant 0 : index
      %c0_16 = arith.constant 0 : index
      %c0_17 = arith.constant 0 : index
      %c0_18 = arith.constant 0 : index
      %27 = vector.load %arg5[%c0_15, %c0_16, %c0_17, %c0_18] : memref<1x1x4x128xf32, #tpu.memory_space<vmem>>, vector<1x1x4x128xf32>
      tpu.vector_store %arg5[%c0_15, %c0_16, %c0_17, %c0_18], %26 {strides = array<i32>} : memref<1x1x4x128xf32, #tpu.memory_space<vmem>>, vector<1x1x4x128xf32>,
      %cst_19 = arith.constant 0.000000e+00 : f32
      %28 = vector.broadcast %cst_19 : f32 to vector<1x1x4x128xf32>
      %c0_20 = arith.constant 0 : index
      %c0_21 = arith.constant 0 : index
      %c0_22 = arith.constant 0 : index
      %c0_23 = arith.constant 0 : index
      %29 = vector.load %arg6[%c0_20, %c0_21, %c0_22, %c0_23] : memref<1x1x4x128xf32, #tpu.memory_space<vmem>>, vector<1x1x4x128xf32>
      tpu.vector_store %arg6[%c0_20, %c0_21, %c0_22, %c0_23], %28 {strides = array<i32>} : memref<1x1x4x128xf32, #tpu.memory_space<vmem>>, vector<1x1x4x128xf32>,
    } else {
    }
    %c0 = arith.constant 0 : index
    %c0_1 = arith.constant 0 : index
    %c0_2 = arith.constant 0 : index
    %c0_3 = arith.constant 0 : index
    %3 = vector.load %arg3[%c0, %c0_1, %c0_2, %c0_3] : memref<1x4x8x128xf32, #tpu.memory_space<vmem>>, vector<1x4x8x128xf32>
    %c0_4 = arith.constant 0 : index
    %c0_5 = arith.constant 0 : index
    %c0_6 = arith.constant 0 : index
    %c0_7 = arith.constant 0 : index
    %4 = vector.load %arg4[%c0_4, %c0_5, %c0_6, %c0_7] : memref<1x4x8x128xf32, #tpu.memory_space<vmem>>, vector<1x4x8x128xf32>
    %cst = arith.constant dense<0xFF800000> : vector<1x8x128xf32>
    %5 = vector.multi_reduction <maximumf>, %3, %cst [1] : vector<1x4x8x128xf32> to vector<1x8x128xf32>
    %6 = vector.shape_cast %5 : vector<1x8x128xf32> to vector<1x1x8x128xf32>
    %7 = vector.broadcast %6 : vector<1x1x8x128xf32> to vector<1x4x8x128xf32>
    %8 = arith.subf %3, %7 : vector<1x4x8x128xf32>
    %9 = math.exp %8 : vector<1x4x8x128xf32>
    %cst_8 = arith.constant dense<0.000000e+00> : vector<1x8x128xf32>
    %10 = vector.multi_reduction <add>, %9, %cst_8 [1] : vector<1x4x8x128xf32> to vector<1x8x128xf32>
    %11 = vector.shape_cast %10 : vector<1x8x128xf32> to vector<1x1x8x128xf32>
    %12 = tpu.reciprocal %11 : vector<1x1x8x128xf32> -> vector<1x1x8x128xf32>
    %13 = vector.broadcast %12 : vector<1x1x8x128xf32> to vector<1x4x8x128xf32>
    %14 = arith.mulf %9, %13 : vector<1x4x8x128xf32>
    %c1_i32 = arith.constant 1 : i32
    %15 = arith.muli %arg1, %c1_i32 : i32
    %16 = arith.addi %15, %arg2 : i32
    %c1024_i32 = arith.constant 1024 : i32
    %17 = arith.muli %16, %c1024_i32 : i32
    %c1024_i32_9 = arith.constant 1024 : i32
    %18 = arith.addi %17, %c1024_i32_9 : i32
    %c256_i32 = arith.constant 256 : i32
    %19 = arith.cmpi sle, %18, %c256_i32 : i32
    %20 = arith.extui %19 : i1 to i32
    %c0_i32_10 = arith.constant 0 : i32
    %21 = arith.cmpi ne, %20, %c0_i32_10 : i32
    scf.if %21 {
      %26 = arith.mulf %14, %4 : vector<1x4x8x128xf32>
      %cst_14 = arith.constant dense<0.000000e+00> : vector<1x4x128xf32>
      %27 = vector.multi_reduction <add>, %26, %cst_14 [2] : vector<1x4x8x128xf32> to vector<1x4x128xf32>
      %cst_15 = arith.constant dense<0.000000e+00> : vector<1x4x128xf32>
      %28 = vector.multi_reduction <add>, %14, %cst_15 [2] : vector<1x4x8x128xf32> to vector<1x4x128xf32>
      %cst_16 = arith.constant dense<0.000000e+00> : vector<1x4x128xf32>
      %29 = vector.multi_reduction <add>, %4, %cst_16 [2] : vector<1x4x8x128xf32> to vector<1x4x128xf32>
      %30 = arith.addf %28, %29 : vector<1x4x128xf32>
      %c0_17 = arith.constant 0 : index
      %c0_18 = arith.constant 0 : index
      %c0_19 = arith.constant 0 : index
      %c0_20 = arith.constant 0 : index
      %31 = vector.load %arg5[%c0_17, %c0_18, %c0_19, %c0_20] : memref<1x1x4x128xf32, #tpu.memory_space<vmem>>, vector<1x1x4x128xf32>
      %32 = vector.shape_cast %27 : vector<1x4x128xf32> to vector<1x1x4x128xf32>
      %33 = arith.addf %31, %32 : vector<1x1x4x128xf32>
      %c0_21 = arith.constant 0 : index
      %c0_22 = arith.constant 0 : index
      %c0_23 = arith.constant 0 : index
      %c0_24 = arith.constant 0 : index
      %34 = vector.load %arg5[%c0_21, %c0_22, %c0_23, %c0_24] : memref<1x1x4x128xf32, #tpu.memory_space<vmem>>, vector<1x1x4x128xf32>
      tpu.vector_store %arg5[%c0_21, %c0_22, %c0_23, %c0_24], %33 {strides = array<i32>} : memref<1x1x4x128xf32, #tpu.memory_space<vmem>>, vector<1x1x4x128xf32>,
      %c0_25 = arith.constant 0 : index
      %c0_26 = arith.constant 0 : index
      %c0_27 = arith.constant 0 : index
      %c0_28 = arith.constant 0 : index
      %35 = vector.load %arg6[%c0_25, %c0_26, %c0_27, %c0_28] : memref<1x1x4x128xf32, #tpu.memory_space<vmem>>, vector<1x1x4x128xf32>
      %36 = vector.shape_cast %30 : vector<1x4x128xf32> to vector<1x1x4x128xf32>
      %37 = arith.addf %35, %36 : vector<1x1x4x128xf32>
      %c0_29 = arith.constant 0 : index
      %c0_30 = arith.constant 0 : index
      %c0_31 = arith.constant 0 : index
      %c0_32 = arith.constant 0 : index
      %38 = vector.load %arg6[%c0_29, %c0_30, %c0_31, %c0_32] : memref<1x1x4x128xf32, #tpu.memory_space<vmem>>, vector<1x1x4x128xf32>
      tpu.vector_store %arg6[%c0_29, %c0_30, %c0_31, %c0_32], %37 {strides = array<i32>} : memref<1x1x4x128xf32, #tpu.memory_space<vmem>>, vector<1x1x4x128xf32>,
    } else {
    }
    %c1024_i32_11 = arith.constant 1024 : i32
    %22 = arith.addi %17, %c1024_i32_11 : i32
    %c256_i32_12 = arith.constant 256 : i32
    %23 = arith.cmpi sgt, %22, %c256_i32_12 : i32
    %24 = arith.extui %23 : i1 to i32
    %c0_i32_13 = arith.constant 0 : i32
    %25 = arith.cmpi ne, %24, %c0_i32_13 : i32
    scf.if %25 {
      %26 = tpu.iota {dimensions = array<i32: 2>} : vector<1x1x8x128xi32>
      %27 = tpu.iota {dimensions = array<i32: 3>} : vector<1x1x8x128xi32>
      %c128_i32 = arith.constant 128 : i32
      %28 = vector.broadcast %c128_i32 : i32 to vector<1x1x8x128xi32>
      %29 = arith.muli %26, %28 : vector<1x1x8x128xi32>
      %30 = vector.broadcast %17 : i32 to vector<1x1x8x128xi32>
      %31 = arith.addi %30, %29 : vector<1x1x8x128xi32>
      %32 = arith.addi %31, %27 : vector<1x1x8x128xi32>
      %c256_i32_14 = arith.constant 256 : i32
      %33 = vector.broadcast %c256_i32_14 : i32 to vector<1x1x8x128xi32>
      %34 = arith.cmpi slt, %32, %33 : vector<1x1x8x128xi32>
      %cst_15 = arith.constant 0.000000e+00 : f32
      %35 = vector.shape_cast %34 : vector<1x1x8x128xi1> to vector<1x1x8x128xi1>
      %36 = vector.broadcast %35 : vector<1x1x8x128xi1> to vector<1x4x8x128xi1>
      %37 = vector.broadcast %cst_15 : f32 to vector<1x4x8x128xf32>
      %38 = arith.select %36, %14, %37 : vector<1x4x8x128xi1>, vector<1x4x8x128xf32>
      %39 = arith.mulf %38, %4 : vector<1x4x8x128xf32>
      %cst_16 = arith.constant dense<0.000000e+00> : vector<1x4x128xf32>
      %40 = vector.multi_reduction <add>, %39, %cst_16 [2] : vector<1x4x8x128xf32> to vector<1x4x128xf32>
      %cst_17 = arith.constant dense<0.000000e+00> : vector<1x4x128xf32>
      %41 = vector.multi_reduction <add>, %38, %cst_17 [2] : vector<1x4x8x128xf32> to vector<1x4x128xf32>
      %cst_18 = arith.constant dense<0.000000e+00> : vector<1x4x128xf32>
      %42 = vector.multi_reduction <add>, %4, %cst_18 [2] : vector<1x4x8x128xf32> to vector<1x4x128xf32>
      %43 = arith.addf %41, %42 : vector<1x4x128xf32>
      %c0_19 = arith.constant 0 : index
      %c0_20 = arith.constant 0 : index
      %c0_21 = arith.constant 0 : index
      %c0_22 = arith.constant 0 : index
      %44 = vector.load %arg5[%c0_19, %c0_20, %c0_21, %c0_22] : memref<1x1x4x128xf32, #tpu.memory_space<vmem>>, vector<1x1x4x128xf32>
      %45 = vector.shape_cast %40 : vector<1x4x128xf32> to vector<1x1x4x128xf32>
      %46 = arith.addf %44, %45 : vector<1x1x4x128xf32>
      %c0_23 = arith.constant 0 : index
      %c0_24 = arith.constant 0 : index
      %c0_25 = arith.constant 0 : index
      %c0_26 = arith.constant 0 : index
      %47 = vector.load %arg5[%c0_23, %c0_24, %c0_25, %c0_26] : memref<1x1x4x128xf32, #tpu.memory_space<vmem>>, vector<1x1x4x128xf32>
      tpu.vector_store %arg5[%c0_23, %c0_24, %c0_25, %c0_26], %46 {strides = array<i32>} : memref<1x1x4x128xf32, #tpu.memory_space<vmem>>, vector<1x1x4x128xf32>,
      %c0_27 = arith.constant 0 : index
      %c0_28 = arith.constant 0 : index
      %c0_29 = arith.constant 0 : index
      %c0_30 = arith.constant 0 : index
      %48 = vector.load %arg6[%c0_27, %c0_28, %c0_29, %c0_30] : memref<1x1x4x128xf32, #tpu.memory_space<vmem>>, vector<1x1x4x128xf32>
      %49 = vector.shape_cast %43 : vector<1x4x128xf32> to vector<1x1x4x128xf32>
      %50 = arith.addf %48, %49 : vector<1x1x4x128xf32>
      %c0_31 = arith.constant 0 : index
      %c0_32 = arith.constant 0 : index
      %c0_33 = arith.constant 0 : index
      %c0_34 = arith.constant 0 : index
      %51 = vector.load %arg6[%c0_31, %c0_32, %c0_33, %c0_34] : memref<1x1x4x128xf32, #tpu.memory_space<vmem>>, vector<1x1x4x128xf32>
      tpu.vector_store %arg6[%c0_31, %c0_32, %c0_33, %c0_34], %50 {strides = array<i32>} : memref<1x1x4x128xf32, #tpu.memory_space<vmem>>, vector<1x1x4x128xf32>,
    } else {
    }
    return
  }
  func.func @transform_0(%arg0: i32, %arg1: i32, %arg2: i32) -> (i32, i32, i32, i32) {
    %c1_i32 = arith.constant 1 : i32
    %0 = arith.muli %arg1, %c1_i32 : i32
    %1 = arith.addi %0, %arg2 : i32
    %c0_i32 = arith.constant 0 : i32
    %c0_i32_0 = arith.constant 0 : i32
    %c0_i32_1 = arith.constant 0 : i32
    return %arg0, %c0_i32, %1, %c0_i32_0 : i32, i32, i32, i32
  }
  func.func @transform_1(%arg0: i32, %arg1: i32, %arg2: i32) -> (i32, i32, i32, i32) {
    %c1_i32 = arith.constant 1 : i32
    %0 = arith.muli %arg1, %c1_i32 : i32
    %1 = arith.addi %0, %arg2 : i32
    %c0_i32 = arith.constant 0 : i32
    %c0_i32_0 = arith.constant 0 : i32
    %c0_i32_1 = arith.constant 0 : i32
    return %arg0, %c0_i32, %1, %c0_i32_0 : i32, i32, i32, i32
  }
  func.func @transform_2(%arg0: i32, %arg1: i32, %arg2: i32) -> (i32, i32, i32, i32) {
    %c0_i32 = arith.constant 0 : i32
    %c0_i32_0 = arith.constant 0 : i32
    %c0_i32_1 = arith.constant 0 : i32
    return %arg0, %arg1, %c0_i32, %c0_i32_0 : i32, i32, i32, i32
  }
  func.func @transform_3(%arg0: i32, %arg1: i32, %arg2: i32) -> (i32, i32, i32, i32) {
    %c0_i32 = arith.constant 0 : i32
    %c0_i32_0 = arith.constant 0 : i32
    %c0_i32_1 = arith.constant 0 : i32
    return %arg0, %arg1, %c0_i32, %c0_i32_0 : i32, i32, i32, i32
  }
}

</mosaic_0001>

<bundles_post_ra>
// kernel: tpu_custom_call.1
= control target key start
LH: loop header
LB: loop body
LE: loop exit
PB: predicated region body
PF: predicated region fallthrough
CT: control target
= control target key end

     0   :  { %s1408_s0 = inlined_call_operand.hbm [shape: f32[2,4,16,128], index: 0, kind: input, shape index: {}]   ;;  %s1409_s1 = inlined_call_operand.hbm [shape: f32[2,4,16,128], index: 1, kind: input, shape index: {}]   ;;  %s1410_s2 = inlined_call_operand.hbm [shape: f32[2,2,4,128], index: 2, kind: output, shape index: {0}]   ;;  %s1411_s3 = inlined_call_operand.hbm [shape: f32[2,2,4,128], index: 3, kind: output, shape index: {1}]  }
   0x1   :  { %1417 = sst [smem:[#allocation18_spill]] %s1408_s0 }
   0x2   :  { %9 = vsyncpa [#allocation3], 0 }
   0x3   :  { %11 = vsyncpa [#allocation3 + $0x1], 0 }
   0x4   :  { %12 = vsyncpa [#allocation6], 0 }
   0x5   :  { %14 = vsyncpa [#allocation6 + $0x1], 0 }
   0x6   :  { %15 = vsyncpa [#allocation4], 0 }
   0x7   :  { %17 = vsyncpa [#allocation4 + $0x1], 0 }
   0x8   :  { %18 = vsyncpa [#allocation9], 0 }
   0x9   :  { %20 = vsyncpa [#allocation9 + $0x1], 0  ;;  %s1079_s12 = smov 0   ;;  %s1081_s13 = smov 0  }
   0xa   :  { %s1083_s14 = smov 0   ;;  %s1085_s15 = smov 0  }
   0xb   :  { %s1087_s16 = smov 0   ;;  %s1089_s17 = smov 0  }
   0xc   :  { %s1091_s18 = smov 0   ;;  %s1093_s19 = smov 0  }
   0xd LB: > { %1418 = sst [smem:[#allocation14_spill]] %s1041_s17  ;;  %s735_s20 = sadd.s32 4294967295, %s1049_s19   ;;  %s1049_s19 = sphi %s1093_s19, %s26_s19   ;;  %s1045_s18 = sphi %s1091_s18, %s1433_s18   ;;  %s1041_s17 = sphi %s1089_s17, %s1432_s17   ;;  %s1037_s16 = sphi %s1087_s16, %s1431_s16   ;;  %s1033_s15 = sphi %s1085_s15, %s1430_s15   ;;  %s1029_s14 = sphi %s1083_s14, %s1436_s14   ;;  %s1025_s13 = sphi %s1081_s13, %s1435_s13   ;;  %s1021_s12 = sphi %s1079_s12, %s1434_s12  }
   0xe   : > { %1419 = sst [smem:[#allocation15_spill]] %s1045_s18  ;;  %s736_s21 = sadd.s32 4294967294, %s1049_s19  }
   0xf   : > { %s41_s22 = sadd.s32 1, %s1041_s17  ;;  %s45_s23 = sadd.s32 1, %s1045_s18 }
  0x10   : > { %p43_p0 = scmp.ge.s32.totalorder %s41_s22, 2  ;;  %s56_s24 = sadd.s32 1, %s1029_s14 }
  0x11   : > { %p63_p1 = scmp.ne.s32.totalorder %s1029_s14, %s1025_s13  ;;  %p64_p2 = scmp.eq.s32.totalorder %s1049_s19, 0 }
  0x12   : > { %s1438_s22 = smov (%p43_p0, %s41_s22), 0  ;;  %s1440_s23 = smov (!%p43_p0, %s45_s23), %s1045_s18 }
  0x13   : > { %1420 = sst [smem:[#allocation16_spill]] %s1438_s22  ;;  %s52_s25 = ssub.s32 %s1041_s17, %s1438_s22 }
  0x14   : > { %p1132_p3 = por %p64_p2, %p63_p1  ;;  %p47_p4 = scmp.ge.s32.totalorder %s1440_s23, 2 }
  0x15   : > { %p69_p5 = scmp.ne.s32.totalorder %s1025_s13, %s1021_s12  ;;  %p70_p6 = scmp.eq.s32.totalorder %s735_s20, 0 }
  0x16   : > { %p125_p7 = scmp.eq.s32.totalorder %s735_s20, 3  ;;  %s1442_s23 = smov (%p47_p4, %s1440_s23), 0 }
  0x17   : > { %1422 = sst [smem:[#allocation17_spill]] %s1442_s23  ;;  %p1140_p8 = por %p70_p6, %p69_p5 }
  0x18   : > { %p1144_p9 = por %p125_p7, %p63_p1  ;;  %s51_s29 = ssub.s32 %s1045_s18, %s1442_s23 }
  0x19   : > { %p131_p10 = scmp.eq.s32.totalorder %s736_s21, 3  ;;  %s53_s30 = sor.u32 %s52_s25, %s51_s29 }
  0x1a   : > { %p54_p11 = scmp.eq.s32.totalorder %s53_s30, 0  ;;  %p783_p13 = scmp.lt.s32.totalorder %s1049_s19, 4 }
  0x1b   : > { %p1150_p12 = por %p131_p10, %p69_p5  ;;  %s1156_s5 = sand.u32 1, %s1029_s14  }
  0x1c   : > { %s1159_s6 = scalar_select %p54_p11, %s1029_s14, %s56_s24  }
  0x1d   : > { %s1412_s7 = sshll.u32 %s1156_s5, 5  ;;  %s740_s8 = sshll.u32 %s1045_s18, 3 }
  0x1e   : > { %s1164_s9 = sadd.s32 %s1041_s17, %s740_s8  ;;  %s183_s10 = scalar_lea.vmem [#allocation2], %s1412_s7 }
  0x1f   : > { %s192_s11 = sshll.u32 %s183_s10, 4  ;;  %s741_s20 = sshll.u32 %s1164_s9, 7  ;;  %s193_s11 = int_to_ptr.vmem [resolvable:$true] %s192_s11 }
  0x20   : > { %s1426_s0 = sld [smem:[#allocation18_spill]]  ;;  %p1174_p0 = pnand %p783_p13, %p1132_p3 }
  0x21   : > { %s180_s24 = scalar_lea.sflag [#allocation3], %s1156_s5  ;;  %s876_s8 = scalar_lea.vmem %s193_s11, 512 }
  0x22   : > { %p865_p1 = pneg %p1174_p0  ;;  %p877_p2 = scmp.ne.s32.totalorder %s193_s11, %s876_s8 }
  0x23   : > { %s1051_s9 = smov [#allocation2]  }
  0x24   : > { %p879_p4 = pnand %p877_p2, %p865_p1  ;;  %s881_s10 = sshll.u32 %s1051_s9, 4  ;;  %s882_s10 = int_to_ptr.vmem [resolvable:$false] %s881_s10 }
  0x25   : > { %s883_s21 = scalar_lea.vmem %s882_s10, 1024  ;;  %p884_p6 = scmp.lt.s32.totalorder %s193_s11, %s882_s10 }
  0x26   : > { %s191_s29 = scalar_lea.hbm %s1426_s0, %s741_s20  ;;  %p880_p5 = pneg %p879_p4 }
  0x27   : > { %p885_p3 = scmp.lt.s32.totalorder %s883_s21, %s876_s8 }
  0x29   : > { %p886_p7 = por %p885_p3, %p884_p6 }
  0x2b   : > { %p887_p10 = pnand %p886_p7, %p880_p5 }
  0x2d   : > { %890 = shalt.err (!%p887_p10)
}
  0x2e   : > { %s1052_s26 = smov 256   ;;  %s1053_s25 = smov 128  }
  0x2f   : > { %s1054_s7 = smov 8   ;;  %p745_p11 = scmp.ge.s32.totalorder %s1049_s19, 1 }
  0x30   : > { %772 = dma.hbm_to_vmem [thread:$0]  (!%p1174_p0), %s191_s29, 512, %s193_s11, %s180_s24, %s1052_s26, %s1053_s25, %s1054_s7  }
  0x31   : > { %p223_p13 = scmp.lt.s32.totalorder %s1049_s19, 5  ;;  %s214_s21 = scalar_lea.hbm %s1409_s1, %s741_s20 }
  0x32   : > { %s1429_s0 = sshll.u32 %s1156_s5, 5  ;;  %s203_s18 = scalar_lea.sflag [#allocation6], %s1156_s5 }
  0x33   : > { %p1189_p2 = pnand %p745_p11, %p223_p13  ;;  %s206_s23 = scalar_lea.vmem [#allocation5], %s1429_s0 }
  0x34   : > { %s215_s22 = sshll.u32 %s206_s23, 4  ;;  %s1055_s11 = smov [#allocation5]   ;;  %s216_s22 = int_to_ptr.vmem [resolvable:$true] %s215_s22 }
  0x35   : > { %s904_s17 = scalar_lea.vmem %s216_s22, 512  ;;  %s909_s29 = sshll.u32 %s1055_s11, 4  ;;  %s910_s29 = int_to_ptr.vmem [resolvable:$false] %s909_s29 }
  0x36   : > { %p905_p4 = scmp.ne.s32.totalorder %s216_s22, %s904_s17  ;;  %s911_s24 = scalar_lea.vmem %s910_s29, 1024 }
  0x37   : > { %p912_p3 = scmp.lt.s32.totalorder %s216_s22, %s910_s29  ;;  %p913_p7 = scmp.lt.s32.totalorder %s911_s24, %s904_s17 }
  0x38   : > { %p907_p5 = pnand %p905_p4, %p865_p1 }
  0x39   : > { %p914_p10 = por %p913_p7, %p912_p3 }
  0x3a   : > { %p908_p6 = pneg %p907_p5 }
  0x3c   : > { %p915_p11 = pnand %p914_p10, %p908_p6 }
  0x3e   : > { %918 = shalt.err (!%p915_p11)
}
  0x3f   : > { %775 = dma.hbm_to_vmem [thread:$0]  (!%p1174_p0), %s214_s21, 512, %s216_s22, %s203_s18, %s1052_s26, %s1053_s25, %s1054_s7  }
  0x40   : > { %227 = sbr.rel (%p1189_p2) target bundleno = 239 (0xef), region = 28  ;;  %s1208_s0 = sand.u32 (!%p1189_p2), 1, %s1025_s13  }
  0x41   : > { %s746_s23 = sshll.u32 (!%p1189_p2), %s1208_s0, 5  ;;  %s230_s5 = scalar_lea.sflag (!%p1189_p2), [#allocation3], %s1208_s0 }
  0x42   : > { %s233_s20 = scalar_lea.vmem (!%p1189_p2), [#allocation2], %s746_s23 }
  0x45   : > { %1004 = dma.done.wait (%p1140_p8), %s230_s5, 512  }
  0x46   : > { %1006 = vsyncadd (%p1140_p8), %s230_s5, 4294966784  ;;  %s239_s17 = scalar_lea.sflag [#allocation6], %s1208_s0  ;;  %s242_s18 = scalar_lea.vmem [#allocation5], %s746_s23 }
  0x47   : > { %1008 = dma.done.wait (%p1140_p8), %s239_s17, 512  }
  0x48   : > { %1010 = vsyncadd (%p1140_p8), %s239_s17, 4294966784  ;;  %s748_s22 = sshll.u32 %s1208_s0, 2  ;;  %s750_s7 = sshll.u32 %s1033_s15, 10  ;;  %v1056_v0 = vmov 0.0   ;;  %v283_v1 = vld [vmem:[%s233_s20] sm:$0xff]  ;;  %v284_v2 = vld [vmem:[%s233_s20 + $0x8] sm:$0xff] }
  0x49   : > { %s1223_s30 = scalar_lea.vmem [#allocation7], %s748_s22  ;;  %s1226_s26 = scalar_lea.vmem [#allocation8], %s748_s22  ;;  %v285_v3 = vld [vmem:[%s233_s20 + $0x10] sm:$0xff]  ;;  %v286_v4 = vld [vmem:[%s233_s20 + $0x18] sm:$0xff]  ;;  %v1233_v5 = vld [vmem:[%s242_s18] sm:$0xff]  ;;  %v291_v7 = vmax.f32 %v283_v1, %v284_v2 }
  0x4a   : > { %281 = vst [vmem:[%s1223_s30] sm:$0xf] %v1056_v0  ;;  %282 = vst [vmem:[%s1226_s26] sm:$0xf] %v1056_v0  ;;  %s1231_s25 = sadd.s32 1024, %s750_s7  ;;  %v1235_v6 = vld [vmem:[%s242_s18 + $0x8] sm:$0xff]  ;;  %v1237_v8 = vld [vmem:[%s242_s18 + $0x10] sm:$0xff]  ;;  %v292_v10 = vmax.f32 %v285_v3, %v286_v4 }
  0x4b   : > { %v1239_v9 = vld [vmem:[%s242_s18 + $0x18] sm:$0xff]  ;;  %p751_p8 = scmp.gt.s32.totalorder %s1231_s25, 256 }
  0x4c   : > { %v293_v11 = vmax.f32 %v291_v7, %v292_v10 }
  0x4e   : > { %v294_v12 = vsub.f32 %v283_v1, %v293_v11  ;;  %v295_v13 = vsub.f32 %v284_v2, %v293_v11  ;;  %v296_v14 = vsub.f32 %v285_v3, %v293_v11  ;;  %v297_v15 = vsub.f32 %v286_v4, %v293_v11 }
  0x50   : > { %v298_v16 = vmul.f32 1.442695, %v294_v12  ;;  %v300_v17 = vmul.f32 1.442695, %v295_v13  ;;  %v302_v18 = vmul.f32 1.442695, %v296_v14 }
  0x51   : > { %v304_v19 = vmul.f32 1.442695, %v297_v15 }
  0x52   : > { %853 = vpow2.f32 %v298_v16 }
  0x53   : > { %855 = vpow2.f32 %v300_v17 }
  0x54   : > { %857 = vpow2.f32 %v302_v18 }
  0x55   : > { %859 = vpow2.f32 %v304_v19 }
  0x5f   : > { %v854_v20 = vpop.eup %853 }
  0x60   : > { %v856_v21 = vpop.eup %855 }
  0x61   : > { %v858_v22 = vpop.eup %857  ;;  %v306_v23 = vadd.f32 %v856_v21, %v854_v20 }
  0x62   : > { %v860_v24 = vpop.eup %859 }
  0x63   : > { %v307_v25 = vadd.f32 %v858_v22, %v306_v23 }
  0x65   : > { %v308_v26 = vadd.f32 %v860_v24, %v307_v25 }
  0x67   : > { %861 = vrcp.f32 %v308_v26 }
  0x71   : > { %320 = sbr.rel (%p751_p8) target bundleno = 149 (0x95), region = 44 }
  0x74   : > { %v862_v27 = vpop.eup %861 }
  0x75   : > { %v1241_v28 = vmul.f32 %v862_v27, %v854_v20  ;;  %v1243_v29 = vmul.f32 %v862_v27, %v856_v21  ;;  %v1245_v30 = vmul.f32 %v862_v27, %v858_v22  ;;  %v1247_v31 = vmul.f32 %v862_v27, %v860_v24 }
  0x76   : > { %vm406_vm0 = vcmask 1041409   ;;  %vm408_vm1 = vcmask 1042434   ;;  %vm410_vm2 = vcmask 1043459   ;;  %v373_v16 = vrot.slane %v1233_v5, 4  ;;  %v401_v17 = vld [vmem:[%s1223_s30] sm:$0xf] }
  0x77   : > { %v321_v32 = vmul.f32 %v1241_v28, %v1233_v5  ;;  %v322_v33 = vmul.f32 %v1243_v29, %v1235_v6  ;;  %v323_v34 = vmul.f32 %v1245_v30, %v1237_v8  ;;  %v324_v35 = vmul.f32 %v1247_v31, %v1239_v9 }
  0x78   : > { %v349_v36 = vrot.slane %v1241_v28, 4  ;;  %v355_v42 = vrot.slane %v1243_v29, 4  ;;  %v361_v43 = vrot.slane %v1245_v30, 4  ;;  %v367_v44 = vrot.slane %v1247_v31, 4 }
  0x79   : > { %v325_v37 = vrot.slane %v321_v32, 4  ;;  %v331_v38 = vrot.slane %v322_v33, 4  ;;  %v337_v39 = vrot.slane %v323_v34, 4  ;;  %v343_v40 = vrot.slane %v324_v35, 4 }
  0x7a   : > { %v350_v41 = vadd.f32 %v349_v36, %v1241_v28  ;;  %v356_v49 = vadd.f32 %v355_v42, %v1243_v29  ;;  %v362_v50 = vadd.f32 %v361_v43, %v1245_v30  ;;  %v368_v51 = vadd.f32 %v367_v44, %v1247_v31 }
  0x7b   : > { %v326_v45 = vadd.f32 %v325_v37, %v321_v32  ;;  %v332_v46 = vadd.f32 %v331_v38, %v322_v33  ;;  %v338_v47 = vadd.f32 %v337_v39, %v323_v34  ;;  %v344_v48 = vadd.f32 %v343_v40, %v324_v35 }
  0x7c   : > { %v351_v56 = vrot.slane %v350_v41, 2  ;;  %v357_v61 = vrot.slane %v356_v49, 2  ;;  %v363_v62 = vrot.slane %v362_v50, 2  ;;  %v369_v63 = vrot.slane %v368_v51, 2 }
  0x7d   : > { %v327_v52 = vrot.slane %v326_v45, 2  ;;  %v333_v53 = vrot.slane %v332_v46, 2  ;;  %v339_v54 = vrot.slane %v338_v47, 2  ;;  %v345_v55 = vrot.slane %v344_v48, 2 }
  0x7e   : > { %v352_v4 = vadd.f32 %v351_v56, %v350_v41  ;;  %v358_v13 = vadd.f32 %v357_v61, %v356_v49  ;;  %v364_v14 = vadd.f32 %v363_v62, %v362_v50  ;;  %v370_v15 = vadd.f32 %v369_v63, %v368_v51  ;;  %v415_v61 = vld [vmem:[%s1226_s26] sm:$0xf] }
  0x7f   : > { %v328_v57 = vadd.f32 %v327_v52, %v326_v45  ;;  %v334_v58 = vadd.f32 %v333_v53, %v332_v46  ;;  %v340_v59 = vadd.f32 %v339_v54, %v338_v47  ;;  %v346_v60 = vadd.f32 %v345_v55, %v344_v48 }
  0x80   : > { %v379_v19 = vrot.slane %v1235_v6, 4  ;;  %v385_v20 = vrot.slane %v1237_v8, 4  ;;  %v391_v21 = vrot.slane %v1239_v9, 4  ;;  %v353_v23 = vrot.slane %v352_v4, 1 }
  0x81   : > { %v329_v0 = vrot.slane %v328_v57, 1  ;;  %v335_v1 = vrot.slane %v334_v58, 1  ;;  %v341_v2 = vrot.slane %v340_v59, 1  ;;  %v347_v3 = vrot.slane %v346_v60, 1 }
  0x82   : > { %v374_v24 = vadd.f32 %v373_v16, %v1233_v5  ;;  %v380_v26 = vadd.f32 %v379_v19, %v1235_v6  ;;  %v386_v27 = vadd.f32 %v385_v20, %v1237_v8  ;;  %v392_v32 = vadd.f32 %v391_v21, %v1239_v9 }
  0x83   : > { %v330_v7 = vadd.f32 %v329_v0, %v328_v57  ;;  %v336_v10 = vadd.f32 %v335_v1, %v334_v58  ;;  %v342_v11 = vadd.f32 %v341_v2, %v340_v59  ;;  %v348_v12 = vadd.f32 %v347_v3, %v346_v60 }
  0x84   : > { %v359_v34 = vrot.slane %v358_v13, 1  ;;  %v365_v35 = vrot.slane %v364_v14, 1  ;;  %v375_v36 = vrot.slane %v374_v24, 2  ;;  %v371_v37 = vrot.slane %v370_v15, 1 }
  0x85   : > { %v407_v18 = vsel %vm406_vm0, %v336_v10, %v330_v7  ;;  %v381_v38 = vrot.slane %v380_v26, 2  ;;  %v387_v39 = vrot.slane %v386_v27, 2  ;;  %v393_v40 = vrot.slane %v392_v32, 2 }
  0x86   : > { %v409_v22 = vsel %vm408_vm1, %v342_v11, %v407_v18  ;;  %v376_v41 = vadd.f32 %v375_v36, %v374_v24  ;;  %v354_v45 = vadd.f32 %v353_v23, %v352_v4  ;;  %v360_v46 = vadd.f32 %v359_v34, %v358_v13 }
  0x87   : > { %v411_v25 = vsel %vm410_vm2, %v348_v12, %v409_v22  ;;  %v382_v42 = vadd.f32 %v381_v38, %v380_v26  ;;  %v388_v43 = vadd.f32 %v387_v39, %v386_v27  ;;  %v394_v44 = vadd.f32 %v393_v40, %v392_v32 }
  0x88   : > { %v413_v33 = vadd.f32 %v411_v25, %v401_v17  ;;  %v366_v47 = vadd.f32 %v365_v35, %v364_v14  ;;  %v377_v48 = vrot.slane %v376_v41, 1  ;;  %v372_v49 = vadd.f32 %v371_v37, %v370_v15 }
  0x89   : > { %v383_v50 = vrot.slane %v382_v42, 1  ;;  %v389_v51 = vrot.slane %v388_v43, 1  ;;  %v395_v52 = vrot.slane %v394_v44, 1 }
  0x8a   : > { %414 = vst [vmem:[%s1223_s30] sm:$0xf] %v413_v33  ;;  %v378_v53 = vadd.f32 %v377_v48, %v376_v41 }
  0x8b   : > { %v384_v54 = vadd.f32 %v383_v50, %v382_v42  ;;  %v390_v55 = vadd.f32 %v389_v51, %v388_v43  ;;  %v396_v56 = vadd.f32 %v395_v52, %v394_v44 }
  0x8c   : > { %v397_v57 = vadd.f32 %v378_v53, %v354_v45 }
  0x8d   : > { %v398_v58 = vadd.f32 %v384_v54, %v360_v46  ;;  %v399_v59 = vadd.f32 %v390_v55, %v366_v47  ;;  %v400_v60 = vadd.f32 %v396_v56, %v372_v49 }
  0x8f   : > { %v420_v62 = vsel %vm406_vm0, %v398_v58, %v397_v57 }
  0x90   : > { %v421_v63 = vsel %vm408_vm1, %v399_v59, %v420_v62 }
  0x91   : > { %v422_v0 = vsel %vm410_vm2, %v400_v60, %v421_v63 }
  0x92   : > { %v424_v1 = vadd.f32 %v422_v0, %v415_v61 }
  0x94   : > { %425 = vst [vmem:[%s1226_s26] sm:$0xf] %v424_v1 }
  0x95 PF: > { %p752_p0 = scmp.le.s32.totalorder %s1231_s25, 256 }
  0x97   : > { %429 = sbr.rel (%p752_p0) target bundleno = 191 (0xbf), region = 48 }
  0x9c   : > { %v430_v2 = vlaneseq  ;;  %v497_v3 = vrot.slane %v1233_v5, 4  ;;  %v503_v4 = vrot.slane %v1235_v6, 4  ;;  %v509_v7 = vrot.slane %v1237_v8, 4 }
  0x9d   : > { %v515_v11 = vrot.slane %v1239_v9, 4  ;;  %v435_v12 = vstv %s750_s7  ;;  %vm530_vm4 = vcmask 1041409   ;;  %vm532_vm5 = vcmask 1042434  }
  0x9e   : > { %v431_v10 = vshrl.u32 %v430_v2, 7  ;;  %v498_v13 = vadd.f32 %v497_v3, %v1233_v5  ;;  %v504_v14 = vadd.f32 %v503_v4, %v1235_v6  ;;  %v510_v15 = vadd.f32 %v509_v7, %v1237_v8 }
  0x9f   : > { %v433_v16 = vand.u32 127, %v430_v2  ;;  %v516_v18 = vadd.f32 %v515_v11, %v1239_v9  ;;  %vm534_vm6 = vcmask 1043459  }
  0xa0   : > { %v434_v17 = vmul.u32 128, %v431_v10  ;;  %v499_v19 = vrot.slane %v498_v13, 2  ;;  %v505_v20 = vrot.slane %v504_v14, 2  ;;  %v511_v21 = vrot.slane %v510_v15, 2 }
  0xa1   : > { %v517_v23 = vrot.slane %v516_v18, 2 }
  0xa2   : > { %v436_v22 = vadd.s32 %v435_v12, %v434_v17  ;;  %v1295_v24 = vadd.f32 %v499_v19, %v498_v13  ;;  %v1297_v25 = vadd.f32 %v505_v20, %v504_v14  ;;  %v1299_v26 = vadd.f32 %v511_v21, %v510_v15 }
  0xa3   : > { %v1301_v32 = vadd.f32 %v517_v23, %v516_v18 }
  0xa4   : > { %v437_v27 = vadd.s32 %v436_v22, %v433_v16  ;;  %v501_v33 = vrot.slane %v1295_v24, 1  ;;  %v507_v34 = vrot.slane %v1297_v25, 1  ;;  %v513_v35 = vrot.slane %v1299_v26, 1 }
  0xa5   : > { %v519_v36 = vrot.slane %v1301_v32, 1 }
  0xa6   : > { %vm438_vm3 = vcmp.lt.s32.totalorder %v437_v27, 256 }
  0xa7   : > { %v441_v37 = vsel %vm438_vm3, %v1241_v28, 0.0  ;;  %v442_v38 = vsel %vm438_vm3, %v1243_v29, 0.0  ;;  %v443_v39 = vsel %vm438_vm3, %v1245_v30, 0.0  ;;  %v444_v40 = vsel %vm438_vm3, %v1247_v31, 0.0 }
  0xa8   : > { %v445_v41 = vmul.f32 %v441_v37, %v1233_v5  ;;  %v446_v42 = vmul.f32 %v442_v38, %v1235_v6  ;;  %v447_v43 = vmul.f32 %v443_v39, %v1237_v8  ;;  %v448_v44 = vmul.f32 %v444_v40, %v1239_v9 }
  0xa9   : > { %v473_v45 = vrot.slane %v441_v37, 4  ;;  %v479_v46 = vrot.slane %v442_v38, 4  ;;  %v485_v47 = vrot.slane %v443_v39, 4  ;;  %v491_v48 = vrot.slane %v444_v40, 4 }
  0xaa   : > { %v449_v49 = vrot.slane %v445_v41, 4  ;;  %v455_v28 = vrot.slane %v446_v42, 4  ;;  %v461_v50 = vrot.slane %v447_v43, 4  ;;  %v467_v29 = vrot.slane %v448_v44, 4 }
  0xab   : > { %v474_v30 = vadd.f32 %v473_v45, %v441_v37  ;;  %v480_v51 = vadd.f32 %v479_v46, %v442_v38  ;;  %v486_v31 = vadd.f32 %v485_v47, %v443_v39  ;;  %v492_v52 = vadd.f32 %v491_v48, %v444_v40  ;;  %v539_v46 = vld [vmem:[%s1226_s26] sm:$0xf] }
  0xac   : > { %v450_v5 = vadd.f32 %v449_v49, %v445_v41  ;;  %v456_v53 = vadd.f32 %v455_v28, %v446_v42  ;;  %v462_v6 = vadd.f32 %v461_v50, %v447_v43  ;;  %v468_v54 = vadd.f32 %v467_v29, %v448_v44  ;;  %v525_v41 = vld [vmem:[%s1223_s30] sm:$0xf] }
  0xad   : > { %v475_v8 = vrot.slane %v474_v30, 2  ;;  %v481_v9 = vrot.slane %v480_v51, 2  ;;  %v487_v55 = vrot.slane %v486_v31, 2  ;;  %v493_v56 = vrot.slane %v492_v52, 2 }
  0xae   : > { %v451_v57 = vrot.slane %v450_v5, 2  ;;  %v457_v58 = vrot.slane %v456_v53, 2  ;;  %v463_v59 = vrot.slane %v462_v6, 2  ;;  %v469_v60 = vrot.slane %v468_v54, 2 }
  0xaf   : > { %v476_v61 = vadd.f32 %v475_v8, %v474_v30  ;;  %v482_v62 = vadd.f32 %v481_v9, %v480_v51  ;;  %v488_v63 = vadd.f32 %v487_v55, %v486_v31  ;;  %v494_v0 = vadd.f32 %v493_v56, %v492_v52 }
  0xb0   : > { %v452_v1 = vadd.f32 %v451_v57, %v450_v5  ;;  %v458_v2 = vadd.f32 %v457_v58, %v456_v53  ;;  %v464_v3 = vadd.f32 %v463_v59, %v462_v6  ;;  %v470_v4 = vadd.f32 %v469_v60, %v468_v54 }
  0xb1   : > { %v477_v7 = vrot.slane %v476_v61, 1  ;;  %v483_v10 = vrot.slane %v482_v62, 1  ;;  %v489_v11 = vrot.slane %v488_v63, 1  ;;  %v495_v12 = vrot.slane %v494_v0, 1 }
  0xb2   : > { %v453_v13 = vrot.slane %v452_v1, 1  ;;  %v459_v14 = vrot.slane %v458_v2, 1  ;;  %v465_v15 = vrot.slane %v464_v3, 1  ;;  %v471_v16 = vrot.slane %v470_v4, 1 }
  0xb3   : > { %v478_v17 = vadd.f32 %v477_v7, %v476_v61  ;;  %v484_v18 = vadd.f32 %v483_v10, %v482_v62  ;;  %v490_v19 = vadd.f32 %v489_v11, %v488_v63  ;;  %v496_v20 = vadd.f32 %v495_v12, %v494_v0 }
  0xb4   : > { %v454_v21 = vadd.f32 %v453_v13, %v452_v1  ;;  %v460_v22 = vadd.f32 %v459_v14, %v458_v2  ;;  %v466_v23 = vadd.f32 %v465_v15, %v464_v3  ;;  %v472_v27 = vadd.f32 %v471_v16, %v470_v4 }
  0xb5   : > { %v502_v37 = vadd.f32 %v501_v33, %v1295_v24  ;;  %v508_v38 = vadd.f32 %v507_v34, %v1297_v25  ;;  %v514_v39 = vadd.f32 %v513_v35, %v1299_v26  ;;  %v520_v40 = vadd.f32 %v519_v36, %v1301_v32 }
  0xb6   : > { %v531_v42 = vsel %vm530_vm4, %v460_v22, %v454_v21 }
  0xb7   : > { %v533_v43 = vsel %vm532_vm5, %v466_v23, %v531_v42  ;;  %v521_v24 = vadd.f32 %v502_v37, %v478_v17  ;;  %v522_v33 = vadd.f32 %v508_v38, %v484_v18  ;;  %v523_v44 = vadd.f32 %v514_v39, %v490_v19 }
  0xb8   : > { %v535_v45 = vsel %vm534_vm6, %v472_v27, %v533_v43  ;;  %v524_v25 = vadd.f32 %v520_v40, %v496_v20 }
  0xb9   : > { %v537_v34 = vadd.f32 %v535_v45, %v525_v41  ;;  %v544_v26 = vsel %vm530_vm4, %v522_v33, %v521_v24 }
  0xba   : > { %v545_v35 = vsel %vm532_vm5, %v523_v44, %v544_v26 }
  0xbb   : > { %538 = vst [vmem:[%s1223_s30] sm:$0xf] %v537_v34  ;;  %v546_v32 = vsel %vm534_vm6, %v524_v25, %v545_v35 }
  0xbc   : > { %v548_v36 = vadd.f32 %v546_v32, %v539_v46 }
  0xbe   : > { %549 = vst [vmem:[%s1226_s26] sm:$0xf] %v548_v36 }
  0xbf PF: > { %s755_s27 = sshll.u32 %s1037_s16, 1  ;;  %s571_s8 = sshll.u32 %s1223_s30, 4  ;;  %s572_s8 = int_to_ptr.vmem [resolvable:$true] %s571_s8 }
  0xc0   : > { %s1339_s9 = sadd.s32 %s1033_s15, %s755_s27  ;;  %s551_s24 = scalar_lea.sflag [#allocation4], %s1208_s0 }
  0xc1   : > { %s756_s10 = sshll.u32 %s1339_s9, 6  ;;  %s919_s23 = scalar_lea.vmem %s572_s8, 64 }
  0xc2   : > { %s569_s29 = scalar_lea.hbm %s1410_s2, %s756_s10  ;;  %p920_p1 = scmp.ne.s32.totalorder %s572_s8, %s919_s23 }
  0xc3   : > { %s1057_s5 = smov [#allocation7]  }
  0xc4   : > { %p921_p13 = pnand %p920_p1, %p1144_p9  ;;  %s923_s16 = sshll.u32 %s1057_s5, 4  ;;  %s924_s16 = int_to_ptr.vmem [resolvable:$false] %s923_s16 }
  0xc5   : > { %s925_s15 = scalar_lea.vmem %s924_s16, 128  ;;  %p926_p4 = scmp.lt.s32.totalorder %s572_s8, %s924_s16 }
  0xc6   : > { %p922_p2 = pneg %p921_p13  ;;  %p927_p5 = scmp.lt.s32.totalorder %s925_s15, %s919_s23 }
  0xc8   : > { %p928_p6 = por %p927_p5, %p926_p4 }
  0xca   : > { %p929_p3 = pnand %p928_p6, %p922_p2 }
  0xcc   : > { %932 = shalt.err (!%p929_p3)
}
  0xcd   : > { %s933_s20 = scalar_lea.hbm %s569_s29, 64  ;;  %s937_s22 = scalar_lea.hbm %s1410_s2, 256 }
  0xce   : > { %p934_p7 = scmp.ne.s32.totalorder %s569_s29, %s933_s20  ;;  %p938_p8 = scmp.lt.s32.totalorder %s569_s29, %s1410_s2 }
  0xcf   : > { %p939_p0 = scmp.lt.s32.totalorder %s937_s22, %s933_s20 }
  0xd0   : > { %p935_p10 = pnand %p934_p7, %p1144_p9 }
  0xd1   : > { %p940_p1 = por %p939_p0, %p938_p8 }
  0xd2   : > { %p936_p11 = pneg %p935_p10 }
  0xd4   : > { %p941_p13 = pnand %p940_p1, %p936_p11 }
  0xd6   : > { %944 = shalt.err (!%p941_p13)
}
  0xd7   : > { %765 = dma.vmem_to_hbm [thread:$0]  (%p1144_p9), %s572_s8, 64, %s569_s29, %s551_s24  }
  0xd8   : > { %s584_s21 = scalar_lea.hbm %s1411_s3, %s756_s10  ;;  %s586_s11 = sshll.u32 %s1226_s26, 4  ;;  %s587_s11 = int_to_ptr.vmem [resolvable:$true] %s586_s11 }
  0xd9   : > { %s556_s23 = scalar_lea.sflag [#allocation9], %s1208_s0  ;;  %s945_s5 = scalar_lea.vmem %s587_s11, 64 }
  0xda   : > { %p946_p2 = scmp.ne.s32.totalorder %s587_s11, %s945_s5  ;;  %s1058_s16 = smov [#allocation8]  }
  0xdb   : > { %s949_s15 = sshll.u32 %s1058_s16, 4  ;;  %s950_s15 = int_to_ptr.vmem [resolvable:$false] %s949_s15 }
  0xdc   : > { %p947_p4 = pnand %p946_p2, %p1144_p9  ;;  %s951_s20 = scalar_lea.vmem %s950_s15, 128 }
  0xdd   : > { %p952_p6 = scmp.lt.s32.totalorder %s587_s11, %s950_s15  ;;  %p953_p3 = scmp.lt.s32.totalorder %s951_s20, %s945_s5 }
  0xde   : > { %p948_p5 = pneg %p947_p4 }
  0xdf   : > { %p954_p7 = por %p953_p3, %p952_p6 }
  0xe1   : > { %p955_p10 = pnand %p954_p7, %p948_p5 }
  0xe3   : > { %958 = shalt.err (!%p955_p10)
}
  0xe4   : > { %s959_s9 = scalar_lea.hbm %s584_s21, 64  ;;  %s963_s8 = scalar_lea.hbm %s1411_s3, 256 }
  0xe5   : > { %p960_p11 = scmp.ne.s32.totalorder %s584_s21, %s959_s9  ;;  %p964_p1 = scmp.lt.s32.totalorder %s584_s21, %s1411_s3 }
  0xe6   : > { %p965_p13 = scmp.lt.s32.totalorder %s963_s8, %s959_s9 }
  0xe7   : > { %p961_p8 = pnand %p960_p11, %p1144_p9 }
  0xe8   : > { %p966_p2 = por %p965_p13, %p964_p1 }
  0xe9   : > { %p962_p0 = pneg %p961_p8 }
  0xeb   : > { %p967_p4 = pnand %p966_p2, %p962_p0 }
  0xed   : > { %970 = shalt.err (!%p967_p4)
}
  0xee   : > { %766 = dma.vmem_to_hbm [thread:$0]  (%p1144_p9), %s587_s11, 64, %s584_s21, %s556_s23  }
  0xef PF: > { %p784_p5 = scmp.ge.s32.totalorder %s1049_s19, 2  ;;  %s598_s24 = sand.u32 1, %s1021_s12  }
  0xf0   : > { %s599_s17 = scalar_lea.sflag [#allocation4], %s598_s24 }
  0xf1   : > { %p777_p6 = pnand %p784_p5, %p1150_p12 }
  0xf3   : > { %p778_p3 = pneg %p777_p6 }
  0xf5   : > { %1012 = dma.done.wait (%p778_p3), %s599_s17, 64  }
  0xf6   : > { %1014 = vsyncadd (%p778_p3), %s599_s17, 4294967232  ;;  %s608_s18 = scalar_lea.sflag [#allocation9], %s598_s24 }
  0xf7   : > { %1016 = dma.done.wait (%p778_p3), %s608_s18, 64  }
  0xf8   : > { %1018 = vsyncadd (%p778_p3), %s608_s18, 4294967232  ;;  %s26_s19 = sadd.s32 1, %s1049_s19   ;;  %s1430_s15 = sld [smem:[#allocation14_spill]] }
  0xf9   : > { %p23_p7 = scmp.ge.s32.totalorder %s26_s19, 6   ;;  %s1431_s16 = sld [smem:[#allocation15_spill]] }
  0xfa   : > { %s1432_s17 = sld [smem:[#allocation16_spill]]  ;;  %s1434_s12 = smov %s1025_s13 }
  0xfb   : > { %s1433_s18 = sld [smem:[#allocation17_spill]]  ;;  %s1435_s13 = smov %s1029_s14 }
  0xfc   : > { %s1436_s14 = smov %s1159_s6  ;;  %25 = sbr.rel (!%p23_p7) target bundleno = 13 (0xd), region = 115 }
 0x101   :  { %613 = vsyncpa [#allocation3], 1 }
 0x102   :  { %615 = vsyncpa [#allocation3 + $0x1], 1 }
 0x103   :  { %616 = vsyncpa [#allocation6], 1 }
 0x104   :  { %618 = vsyncpa [#allocation6 + $0x1], 1 }
 0x105   :  { %619 = vsyncpa [#allocation4], 1 }
 0x106   :  { %621 = vsyncpa [#allocation4 + $0x1], 1 }
 0x107   :  { %622 = vsyncpa [#allocation9], 1 }
 0x108   :  { %624 = vsyncpa [#allocation9 + $0x1], 1 }

</bundles_post_ra>
